<compile_context>
chip_gen: v5e
topology: v5e:2x2
jax: 0.10.0
libtpu: 0.0.40
codegen_flags: <defaults>
</compile_context>

<pallas_src>
import jax
import jax.numpy as jnp
from jax.experimental import pallas as pl
from jax.experimental.pallas import tpu as pltpu


def _channel_gate_kernel(x_ref, w_ref, b_ref, o_ref):
    """x_ref: (1, C, THW)  input tile  (channels on sublanes, space on lanes)
       w_ref: (C, 1)       1x1-conv weight as a column vector
       b_ref: (1,)         conv bias (SMEM scalar)
       o_ref: (1, C, THW)  gated output tile"""
    x = x_ref[0]                                            # (C, THW)
    w = w_ref[...]                                          # (C, 1)
    # 1x1 conv over channels == per-pixel weighted channel sum. C is tiny, so
    # a VPU multiply + sublane (XLU) reduce is the right tool; for large C this
    # would become a jnp.dot on the MXU.
    logits = jnp.sum(x.astype(jnp.float32) * w.astype(jnp.float32),
                     axis=0, keepdims=True) + b_ref[0]      # (1, THW) f32
    gate = 1.0 / (1.0 + jnp.exp(-logits))                   # sigmoid (EUP exp)
    o_ref[0] = (x * gate).astype(o_ref.dtype)               # broadcast over C


def _pick_hw_tile(hw, c, itemsize):
    """Largest lane-aligned (multiple-of-128) spatial tile whose in+out blocks
    stay well inside scoped VMEM (v7x: 64 MiB physical / 32 MiB scoped)."""
    if hw % 128 != 0:
        return hw                       # odd sizes: single full (untiled) block
    budget_bytes = 4 * 1024 * 1024      # conservative per-buffer in+out budget
    max_thw = budget_bytes // max(1, 2 * c * itemsize)
    max_thw = max(128, (max_thw // 128) * 128)
    if hw <= max_thw:
        return hw
    best, t = 128, 256
    while t <= max_thw:                 # largest multiple-of-128 divisor of hw
        if hw % t == 0:
            best = t
        t += 128
    return best


def channel_gate_2d(x_nchw, w_oihw, bias):
    """ChannelGate2d forward.
       x_nchw: (B, C, H, W)   w_oihw: (1, C, 1, 1) (PyTorch Conv2d)   bias: (1,)"""
    B, C, H, W = x_nchw.shape
    HW = H * W
    thw = _pick_hw_tile(HW, C, x_nchw.dtype.itemsize)

    x2 = x_nchw.reshape(B, C, HW)       # free reshape: contiguous merge of H,W
    w_col = w_oihw.reshape(C, 1)        # (1,C,1,1) -> (C,1) column
    b1 = bias.reshape((1,))

    out = pl.pallas_call(
        _channel_gate_kernel,
        out_shape=jax.ShapeDtypeStruct((B, C, HW), x_nchw.dtype),
        grid=(B, HW // thw),
        in_specs=[
            pl.BlockSpec((1, C, thw), lambda b, t: (b, 0, t)),
            pl.BlockSpec((C, 1), lambda b, t: (0, 0)),
            pl.BlockSpec(memory_space=pltpu.MemorySpace.SMEM),
        ],
        out_specs=pl.BlockSpec((1, C, thw), lambda b, t: (b, 0, t)),
        compiler_params=pltpu.CompilerParams(
            dimension_semantics=("parallel", "parallel")),
    )(x2, w_col, b1)

    return out.reshape(B, C, H, W)


def _reference(x, w, b):
    """Pure-XLA reference matching the PyTorch module semantics."""
    logits = jnp.einsum('bchw,c->bhw', x, w[0, :, 0, 0])[:, None, :, :]
    logits = logits + b[None, :, None, None]
    return x * jax.nn.sigmoid(logits)


if __name__ == "__main__":
    B, C, H, W = 2, 4, 16, 16           # batch=2, in_channels=4, spatial=16

    key = jax.random.PRNGKey(0)
    kx, kw, kb = jax.random.split(key, 3)
    x = jax.random.normal(kx, (B, C, H, W), jnp.float32)
    w = 0.5 * jax.random.normal(kw, (1, C, 1, 1), jnp.float32)   # Conv2d(C,1,1) OIHW
    b = 0.1 * jax.random.normal(kb, (1,), jnp.float32)

    out = jax.block_until_ready(channel_gate_2d(x, w, b))
    ref = jax.block_until_ready(_reference(x, w, b))

    assert out.shape == (B, C, H, W), out.shape
    err = float(jnp.max(jnp.abs(out - ref)))
    assert jnp.allclose(out, ref, atol=1e-5, rtol=1e-5), err

    print("KERNEL_OK")
</pallas_src>

<mosaic_0001>
module attributes {stable_mosaic.version = 11 : i64} {
  func.func @_channel_gate_kernel(%arg0: i32, %arg1: i32, %arg2: memref<1x4x256xf32, #tpu.memory_space<vmem>>, %arg3: memref<4x1xf32, #tpu.memory_space<vmem>>, %arg4: memref<1xf32, #tpu.memory_space<smem>>, %arg5: memref<1x4x256xf32, #tpu.memory_space<vmem>>) attributes {dimension_semantics = [#tpu.dimension_semantics<parallel>, #tpu.dimension_semantics<parallel>], iteration_bounds = array<i64: 2, 1>, scalar_prefetch = 0 : i64, scratch_operands = 0 : i64, tpu.core_type = #tpu.core_type<tc>, window_params = [{transform_indices = @transform_0, window_bounds = array<i64: 1, 4, 256>}, {pipeline_mode = #tpu.pipeline_mode<synchronous>, transform_indices = @transform_1, window_bounds = array<i64: 4, 1>}, {transform_indices = @transform_2, window_bounds = array<i64: 1>}, {transform_indices = @transform_3, window_bounds = array<i64: 1, 4, 256>}]} {
    %c0 = arith.constant 0 : index
    %c0_0 = arith.constant 0 : index
    %c0_1 = arith.constant 0 : index
    %0 = vector.load %arg2[%c0, %c0_0, %c0_1] : memref<1x4x256xf32, #tpu.memory_space<vmem>>, vector<1x4x256xf32>
    %1 = vector.shape_cast %0 : vector<1x4x256xf32> to vector<4x256xf32>
    %c0_2 = arith.constant 0 : index
    %c0_3 = arith.constant 0 : index
    %2 = vector.load %arg3[%c0_2, %c0_3] : memref<4x1xf32, #tpu.memory_space<vmem>>, vector<4x1xf32>
    %3 = vector.broadcast %2 : vector<4x1xf32> to vector<4x256xf32>
    %4 = arith.mulf %1, %3 : vector<4x256xf32>
    %cst = arith.constant dense<0.000000e+00> : vector<256xf32>
    %5 = vector.multi_reduction <add>, %4, %cst [0] : vector<4x256xf32> to vector<256xf32>
    %6 = vector.shape_cast %5 : vector<256xf32> to vector<1x256xf32>
    %c0_4 = arith.constant 0 : index
    %7 = memref.load %arg4[%c0_4] : memref<1xf32, #tpu.memory_space<smem>>
    %8 = vector.broadcast %7 : f32 to vector<1x256xf32>
    %9 = arith.addf %6, %8 : vector<1x256xf32>
    %cst_5 = arith.constant 0.000000e+00 : f32
    %10 = vector.broadcast %cst_5 : f32 to vector<1x256xf32>
    %11 = arith.subf %10, %9 : vector<1x256xf32>
    %12 = math.exp %11 : vector<1x256xf32>
    %cst_6 = arith.constant 1.000000e+00 : f32
    %13 = vector.broadcast %cst_6 : f32 to vector<1x256xf32>
    %14 = arith.addf %13, %12 : vector<1x256xf32>
    %cst_7 = arith.constant 1.000000e+00 : f32
    %15 = vector.broadcast %cst_7 : f32 to vector<1x256xf32>
    %16 = arith.divf %15, %14 : vector<1x256xf32>
    %17 = vector.broadcast %16 : vector<1x256xf32> to vector<4x256xf32>
    %18 = arith.mulf %1, %17 : vector<4x256xf32>
    %c0_8 = arith.constant 0 : index
    %c0_9 = arith.constant 0 : index
    %c0_10 = arith.constant 0 : index
    %19 = vector.load %arg5[%c0_8, %c0_9, %c0_10] : memref<1x4x256xf32, #tpu.memory_space<vmem>>, vector<1x4x256xf32>
    %20 = vector.shape_cast %19 : vector<1x4x256xf32> to vector<4x256xf32>
    %21 = vector.shape_cast %18 : vector<4x256xf32> to vector<1x4x256xf32>
    tpu.vector_store %arg5[%c0_8, %c0_9, %c0_10], %21 {strides = array<i32>} : memref<1x4x256xf32, #tpu.memory_space<vmem>>, vector<1x4x256xf32>,
    return
  }
  func.func @transform_0(%arg0: i32, %arg1: i32) -> (i32, i32, i32) {
    %c0_i32 = arith.constant 0 : i32
    %c0_i32_0 = arith.constant 0 : i32
    return %arg0, %c0_i32, %arg1 : i32, i32, i32
  }
  func.func @transform_1(%arg0: i32, %arg1: i32) -> (i32, i32) {
    %c0_i32 = arith.constant 0 : i32
    %c0_i32_0 = arith.constant 0 : i32
    %c0_i32_1 = arith.constant 0 : i32
    return %c0_i32, %c0_i32_0 : i32, i32
  }
  func.func @transform_2(%arg0: i32, %arg1: i32) -> i32 {
    %c0_i32 = arith.constant 0 : i32
    %c0_i32_0 = arith.constant 0 : i32
    return %c0_i32 : i32
  }
  func.func @transform_3(%arg0: i32, %arg1: i32) -> (i32, i32, i32) {
    %c0_i32 = arith.constant 0 : i32
    %c0_i32_0 = arith.constant 0 : i32
    return %arg0, %c0_i32, %arg1 : i32, i32, i32
  }
}

</mosaic_0001>

<bundles_post_ra>
// kernel: tpu_custom_call.1
= control target key start
LH: loop header
LB: loop body
LE: loop exit
PB: predicated region body
PF: predicated region fallthrough
CT: control target
= control target key end

     0   :  { %s764_s0 = inlined_call_operand.hbm [shape: f32[2,4,256], index: 0, kind: input, shape index: {}]   ;;  %s765_s1 = inlined_call_operand.vmem [shape: f32[4,1], index: 1, kind: input, shape index: {}]   ;;  %s766_s2 = inlined_call_operand.<no memory space> [shape: f32[1], index: 2, kind: input, shape index: {}]   ;;  %s767_s3 = inlined_call_operand.hbm [shape: f32[2,4,256], index: 3, kind: output, shape index: {}]  }
   0x1   :  { %8 = sst [smem:[#allocation2]] %s766_s2 }
   0x2   :  { %9 = vsyncpa [#allocation4], 0 }
   0x3   :  { %11 = vsyncpa [#allocation4 + $0x1], 0 }
   0x4   :  { %12 = vsyncpa [#allocation5], 0 }
   0x5   :  { %14 = vsyncpa [#allocation5 + $0x1], 0  ;;  %s624_s14 = smov 0   ;;  %s626_s15 = smov 0  }
   0x6   :  { %s628_s16 = smov 0   ;;  %s630_s17 = smov 0  }
   0x7   :  { %s632_s18 = smov 0   ;;  %s634_s19 = smov 0  }
   0x8 LB: > { %s395_s2 = sadd.s32 4294967295, %s597_s19   ;;  %s396_s20 = sadd.s32 4294967294, %s597_s19   ;;  %s597_s19 = sphi %s634_s19, %s20_s19   ;;  %s593_s18 = sphi %s632_s18, %s778_s18   ;;  %s589_s17 = sphi %s630_s17, %s777_s17   ;;  %s585_s16 = sphi %s628_s16, %s776_s16   ;;  %s581_s15 = sphi %s626_s15, %s775_s15   ;;  %s577_s14 = sphi %s624_s14, %s774_s14  }
   0x9   : > { %s32_s21 = sadd.s32 1, %s593_s18  ;;  %s41_s22 = sadd.s32 1, %s585_s16 }
   0xa   : > { %p34_p0 = scmp.ge.s32.totalorder %s32_s21, 2  ;;  %p48_p1 = scmp.ne.s32.totalorder %s585_s16, %s581_s15 }
   0xb   : > { %p49_p2 = scmp.eq.s32.totalorder %s597_s19, 0  ;;  %p54_p3 = scmp.ne.s32.totalorder %s581_s15, %s577_s14 }
   0xc   : > { %s780_s21 = smov (%p34_p0, %s32_s21), 0  ;;  %p55_p5 = scmp.eq.s32.totalorder %s395_s2, 0 }
   0xd   : > { %p665_p4 = por %p49_p2, %p48_p1  ;;  %s36_s24 = ssub.s32 %s593_s18, %s780_s21 }
   0xe   : > { %p122_p6 = scmp.eq.s32.totalorder %s395_s2, 1  ;;  %p39_p7 = scmp.eq.s32.totalorder %s36_s24, 0 }
   0xf   : > { %p671_p8 = por %p55_p5, %p54_p3  ;;  %p128_p10 = scmp.eq.s32.totalorder %s396_s20, 1 }
  0x10   : > { %p675_p9 = por %p122_p6, %p48_p1  ;;  %p398_p12 = scmp.ge.s32.totalorder %s597_s19, 2 }
  0x11   : > { %s680_s27 = scalar_select %p39_p7, %s585_s16, %s41_s22  }
  0x12   : > { %p682_p11 = por %p128_p10, %p54_p3  ;;  %p424_p13 = scmp.lt.s32.totalorder %s597_s19, 2 }
  0x13   : > { %s154_s29 = sand.u32 1, %s585_s16   ;;  %s410_s4 = sshll.u32 %s593_s18, 3 }
  0x14   : > { %s399_s30 = sshll.u32 %s154_s29, 3  ;;  %s165_s7 = scalar_lea.hbm %s764_s0, %s410_s4 }
  0x15   : > { %s158_s8 = scalar_lea.vmem [#allocation3], %s399_s30  ;;  %s167_s10 = sshll.u32 %s165_s7, 4  ;;  %s168_s10 = int_to_ptr.hbm [resolvable:$true] %s167_s10 }
  0x16   : > { %s169_s9 = sshll.u32 %s158_s8, 4  ;;  %p417_p0 = pnand %p424_p13, %p665_p4  ;;  %s170_s9 = int_to_ptr.vmem [resolvable:$true] %s169_s9 }
  0x17   : > { %p402_p1 = scmp.ge.s32.totalorder %s597_s19, 1  ;;  %p174_p2 = scmp.lt.s32.totalorder %s597_s19, 3 }
  0x18   : > { %s155_s11 = scalar_lea.sflag [#allocation4], %s154_s29 }
  0x19   : > { %419 = dma.hbm_to_vmem [thread:$0]  (!%p417_p0), %s168_s10, 128, %s170_s9, %s155_s11  }
  0x1a   : > { %p175_p3 = pnand %p402_p1, %p174_p2 }
  0x1b   : > { %s698_s12 = sand.u32 (!%p175_p3), 1, %s581_s15  }
  0x1c   : > { %178 = sbr.rel (%p175_p3) target bundleno = 217 (0xd9), region = 32  ;;  %s403_s13 = sshll.u32 (!%p175_p3), %s698_s12, 3 }
  0x1d   : > { %s181_s2 = scalar_lea.sflag (!%p175_p3), [#allocation4], %s698_s12  ;;  %s184_s20 = scalar_lea.vmem (!%p175_p3), [#allocation3], %s403_s13 }
  0x21   : > { %568 = dma.done.wait (%p671_p8), %s181_s2, 128  }
  0x22   : > { %570 = vsyncadd (%p671_p8), %s181_s2, 4294967168  ;;  %v599_v0 = vmov 0   ;;  %v211_v1 = vld [vmem:[%s765_s1] sm:$0xf]  ;;  %v600_v2 = vmov 839922192  }
  0x23   : > { %476 = vset.pattern.permute.xlu0 %v599_v0  ;;  %v217_v3 = vunpack.c.l.s4 %v600_v2  ;;  %v711_v6 = vld [vmem:[%s184_s20] sm:$0xff]  ;;  %vm228_vm0 = vcmask 1043456   ;;  %s243_s24 = sld [smem:[#allocation2]]  ;;  %s411_s25 = sshll.u32 %s589_s17, 3 }
  0x24   : > { %214 = vperm.xlu0 %476, %v211_v1   ;;  %s306_s4 = scalar_lea.hbm %s767_s3, %s411_s25  ;;  %s207_s17 = scalar_lea.vmem [#allocation6], %s403_s13 }
  0x25   : > { %v218_v4 = vunpack.c.0.s8 %v217_v3  ;;  %s308_s5 = sshll.u32 %s207_s17, 4  ;;  %s310_s6 = sshll.u32 %s306_s4, 4  ;;  %s309_s5 = int_to_ptr.vmem [resolvable:$true] %s308_s5  ;;  %s311_s6 = int_to_ptr.hbm [resolvable:$true] %s310_s6 }
  0x26   : > { %s293_s7 = scalar_lea.sflag [#allocation5], %s698_s12  ;;  %s529_s8 = sshra.s32 %s311_s6, 4  ;;  %s530_s8 = int_to_ptr.hbm [resolvable:$true] %s529_s8 }
  0x27   : > { %s531_s9 = scalar_lea.hbm %s530_s8, 8  ;;  %s535_s13 = scalar_lea.hbm %s767_s3, 16 }
  0x28   : > { %p532_p4 = scmp.ne.s32.totalorder %s530_s8, %s531_s9  ;;  %p536_p7 = scmp.lt.s32.totalorder %s530_s8, %s767_s3 }
  0x29   : > { %v244_v23 = vstv %s243_s24  ;;  %p537_p8 = scmp.lt.s32.totalorder %s535_s13, %s531_s9 }
  0x2a   : > { %p533_p5 = pnand %p532_p4, %p675_p9 }
  0x2b   : > { %p538_p10 = por %p537_p8, %p536_p7 }
  0x2c   : > { %p534_p6 = pneg %p533_p5 }
  0x2e   : > { %p539_p13 = pnand %p538_p10, %p534_p6 }
  0x96   : > { %v215_v5 = vpop.permute.xlu0 %214 }
  0x97   : > { %v219_v7 = vperm.slane %v215_v5, %v218_v4 }
  0x99   : > { %v221_v8 = vmul.f32 %v219_v7, %v711_v6 }
  0x9b   : > { %223 = vst [vmem:[#allocation1] ss:$2 sm:$0xff] %v221_v8 }
  0xa2   : > { %v224_v9 = vld.sshfl [vmem:[#allocation1] sm:$0xff pattern:$0x75316420]  ;;  %v225_v10 = vld.sshfl [vmem:[#allocation1 + $0x8] sm:$0xff pattern:$0x75316420] }
  0xa3   : > { %v229_v11 = vsel %vm228_vm0, %v224_v9, 0.0  ;;  %v236_v12 = vsel %vm228_vm0, %v225_v10, 0.0 }
  0xa4   : > { %v230_v13 = vrot.slane %v229_v11, 4  ;;  %v237_v14 = vrot.slane %v236_v12, 4 }
  0xa6   : > { %v231_v15 = vadd.f32 %v230_v13, %v229_v11  ;;  %v238_v16 = vadd.f32 %v237_v14, %v236_v12 }
  0xa8   : > { %v232_v17 = vrot.slane %v231_v15, 2  ;;  %v239_v18 = vrot.slane %v238_v16, 2 }
  0xaa   : > { %v233_v19 = vadd.f32 %v232_v17, %v231_v15  ;;  %v240_v20 = vadd.f32 %v239_v18, %v238_v16 }
  0xac   : > { %v234_v21 = vrot.slane %v233_v19, 1  ;;  %v241_v22 = vrot.slane %v240_v20, 1 }
  0xae   : > { %v235_v24 = vadd.f32 %v234_v21, %v233_v19  ;;  %v242_v25 = vadd.f32 %v241_v22, %v240_v20 }
  0xb0   : > { %v245_v26 = vadd.f32 %v244_v23, %v235_v24  ;;  %v246_v27 = vadd.f32 %v244_v23, %v242_v25 }
  0xb2   : > { %v247_v28 = vsub.f32 0.0, %v245_v26  ;;  %v248_v29 = vsub.f32 0.0, %v246_v27 }
  0xb4   : > { %v249_v30 = vmul.f32 1.442695, %v247_v28  ;;  %v251_v31 = vmul.f32 1.442695, %v248_v29 }
  0xb6   : > { %477 = vpow2.f32 %v249_v30 }
  0xb7   : > { %479 = vpow2.f32 %v251_v31 }
  0xbc   : > { %v478_v32 = vpop.eup %477 }
  0xbd   : > { %v480_v33 = vpop.eup %479  ;;  %v253_v34 = vadd.f32 1.0, %v478_v32 }
  0xbe   : > { %v254_v35 = vadd.f32 1.0, %v480_v33 }
  0xbf   : > { %481 = vrcp.f32 %v253_v34  ;;  %vm260_vm3 = vweird.f32 %v253_v34  ;;  %v266_v47 = vand.u32 2147483648, %v253_v34  ;;  %v264_v49 = vand.u32 2147483647, %v253_v34 }
  0xc0   : > { %483 = vrcp.f32 %v254_v35  ;;  %v281_v43 = vand.u32 2147483648, %v254_v35  ;;  %v279_v45 = vand.u32 2147483647, %v254_v35  ;;  %vm275_vm5 = vweird.f32 %v254_v35 }
  0xc1   : > { %v267_v54 = vor.u32 1.1754944e-38, %v266_v47  ;;  %vm265_vm8 = vcmp.eq.f32.partialorder %v264_v49, 8.507059e+37 }
  0xc2   : > { %v282_v51 = vor.u32 1.1754944e-38, %v281_v43  ;;  %vm280_vm7 = vcmp.eq.f32.partialorder %v279_v45, 8.507059e+37 }
  0xc5   : > { %v482_v36 = vpop.eup %481 }
  0xc6   : > { %v484_v37 = vpop.eup %483  ;;  %v256_v38 = vmul.f32 %v482_v36, %v253_v34  ;;  %vm261_vm1 = vweird.f32 %v482_v36 }
  0xc7   : > { %v271_v39 = vmul.f32 %v484_v37, %v254_v35  ;;  %vm276_vm2 = vweird.f32 %v484_v37  ;;  %vm717_vm4 = vmor %vm260_vm3, %vm261_vm1 }
  0xc8   : > { %v257_v40 = vsub.f32 1.0, %v256_v38  ;;  %vm277_vm6 = vmor %vm275_vm5, %vm276_vm2 }
  0xc9   : > { %v272_v41 = vsub.f32 1.0, %v271_v39 }
  0xca   : > { %v258_v42 = vmul.f32 %v482_v36, %v257_v40 }
  0xcb   : > { %v273_v44 = vmul.f32 %v484_v37, %v272_v41 }
  0xcc   : > { %v259_v46 = vadd.f32 %v482_v36, %v258_v42 }
  0xcd   : > { %v274_v50 = vadd.f32 %v484_v37, %v273_v44 }
  0xce   : > { %v263_v52 = vsel %vm717_vm4, %v482_v36, %v259_v46 }
  0xcf   : > { %v278_v53 = vsel %vm277_vm6, %v484_v37, %v274_v50  ;;  %v268_v57 = vsel %vm265_vm8, %v267_v54, %v263_v52 }
  0xd0   : > { %v283_v55 = vsel %vm280_vm7, %v282_v51, %v278_v53 }
  0xd1   : > { %v287_v56 = vrot.slane %v283_v55, 4 }
  0xd3   : > { %v288_v58 = vsel %vm228_vm0, %v268_v57, %v287_v56 }
  0xd4   : > { %v290_v59 = vmul.f32 %v288_v58, %v711_v6 }
  0xd6   : > { %291 = vst [vmem:[%s207_s17] sm:$0xff] %v290_v59 }
  0xd7   : > { %542 = shalt.err (!%p539_p13)
}
  0xd8   : > { %414 = dma.vmem_to_hbm [thread:$0]  (%p675_p9), %s309_s5, 128, %s311_s6, %s293_s7  }
  0xd9 PF: > { %s322_s12 = sand.u32 1, %s577_s14   ;;  %p421_p0 = pnand %p398_p12, %p682_p11 }
  0xda   : > { %s323_s22 = scalar_lea.sflag [#allocation5], %s322_s12 }
  0xdb   : > { %p422_p1 = pneg %p421_p0 }
  0xdd   : > { %572 = dma.done.wait (%p422_p1), %s323_s22, 128  }
  0xde   : > { %574 = vsyncadd (%p422_p1), %s323_s22, 4294967168  ;;  %s20_s19 = sadd.s32 1, %s597_s19   ;;  %s774_s14 = smov %s581_s15 }
  0xdf   : > { %p17_p2 = scmp.ge.s32.totalorder %s20_s19, 4   ;;  %s775_s15 = smov %s585_s16 }
  0xe0   : > { %s776_s16 = smov %s680_s27  ;;  %s777_s17 = smov %s593_s18 }
  0xe1   : > { %s778_s18 = smov %s780_s21  ;;  %19 = sbr.rel (!%p17_p2) target bundleno = 8 (0x8), region = 77 }
  0xe6   :  { %329 = vsyncpa [#allocation4], 1 }
  0xe7   :  { %331 = vsyncpa [#allocation4 + $0x1], 1 }
  0xe8   :  { %332 = vsyncpa [#allocation5], 1 }
  0xe9   :  { %334 = vsyncpa [#allocation5 + $0x1], 1 }

</bundles_post_ra>
